<compile_context>
chip_gen: v6e
topology: v6e:2x2x1
jax: 0.10.0
libtpu: 0.0.40
codegen_flags: <defaults>
</compile_context>

<pallas_src>
import math

import jax
import jax.numpy as jnp
from jax.experimental import pallas as pl
from jax.experimental.pallas import tpu as pltpu


def _round_up(x, m):
    return ((x + m - 1) // m) * m


def noisy_linear_kernel(x_ref, w_ref, nw_ref, in_noise_ref, out_noise_ref,
                        bias_ref, o_ref, nacc_ref):
    """Fused NoisyLinear tile kernel (two-matmul / column-scale form).

    Grid is (N_tiles, K_tiles); K (axis 1) is the reduction axis.

    x_ref:         [B, tk]    input activations (K tile), bf16
    w_ref:         [tk, tn]   clean weight, pre-transposed to [in, out], bf16
    nw_ref:        [tk, tn]   noisy-weight parameter, [in, out], bf16
    in_noise_ref:  [1, tk]    input-side noise (row), f32
    out_noise_ref: [1, tn]    output-side noise (row), f32
    bias_ref:      [1, tn]    combined bias = b + noisy_b * out_noise, f32
    o_ref:         [B, tn]    f32 output tile (resident across K; doubles as
                              the clean-path accumulator)
    nacc_ref:      [B, tn]    f32 noisy-path accumulator scratch
    """
    k = pl.program_id(1)

    @pl.when(k == 0)
    def _():
        o_ref[...] = jnp.zeros_like(o_ref)
        nacc_ref[...] = jnp.zeros_like(nacc_ref)

    x = x_ref[...]

    # Clean path: accumulate directly into the resident f32 output block.
    o_ref[...] += jnp.dot(x, w_ref[...], preferred_element_type=jnp.float32)

    # Noisy path: factorised noise applied as a cheap O(B*tk) column scale on x
    # (in_noise) here, and an O(B*tn) row scale (out_noise) at finalize.  No
    # O(tk*tn) combined-weight temporary is ever materialised.
    x_noisy = (x.astype(jnp.float32) * in_noise_ref[...]).astype(x.dtype)
    nacc_ref[...] += jnp.dot(x_noisy, nw_ref[...],
                             preferred_element_type=jnp.float32)

    @pl.when(k == pl.num_programs(1) - 1)
    def _():
        o_ref[...] = o_ref[...] + nacc_ref[...] * out_noise_ref[...] + bias_ref[...]


def prepare_noisy_linear_params(weight, noisy_weight, *, tn=512, tk=2048,
                                weight_dtype=jnp.bfloat16):
    """One-time layout plumbing, hoisted out of the forward path.

    Transposes both weight matrices to [in, out] (so the MXU contracts on the
    RHS sublane axis and the output is lane-dense), zero-pads to tile
    multiples of 128, and casts to the bf16 streaming dtype.  Call ONCE at
    parameter-load time, not per forward — otherwise the pad/transpose copy
    roughly doubles the kernel's own HBM traffic.
    """
    N, K = weight.shape
    k_pad0 = _round_up(K, 128)
    n_pad0 = _round_up(N, 128)
    tk_eff = min(tk, k_pad0)
    tn_eff = min(tn, n_pad0)
    k_pad = _round_up(K, tk_eff)
    n_pad = _round_up(N, tn_eff)

    wt = jnp.pad(weight.T, ((0, k_pad - K), (0, n_pad - N))).astype(weight_dtype)
    nwt = jnp.pad(noisy_weight.T, ((0, k_pad - K), (0, n_pad - N))).astype(weight_dtype)

    return {
        "wt": wt, "nwt": nwt,
        "K": K, "N": N, "k_pad": k_pad, "n_pad": n_pad,
        "tk": tk_eff, "tn": tn_eff,
    }


def noisy_linear_forward(x, params, bias, noisy_bias, in_noise, out_noise):
    """Per-call forward: only tiny per-call tensors are padded/cast here."""
    K, N = params["K"], params["N"]
    k_pad, n_pad = params["k_pad"], params["n_pad"]
    tk, tn = params["tk"], params["tn"]
    wt, nwt = params["wt"], params["nwt"]

    B = x.shape[0]
    b_pad = _round_up(max(B, 8), 8)

    # Tiny per-call layout work (O(B*K) / O(N)); noise changes every forward.
    x_p = jnp.pad(x, ((0, b_pad - B), (0, k_pad - K))).astype(wt.dtype)
    in_row = jnp.pad(in_noise.reshape(1, K).astype(jnp.float32),
                     ((0, 0), (0, k_pad - K)))
    out_row = jnp.pad(out_noise.reshape(1, N).astype(jnp.float32),
                      ((0, 0), (0, n_pad - N)))
    bias_comb = (bias + noisy_bias * out_noise).reshape(1, N).astype(jnp.float32)
    bias_p = jnp.pad(bias_comb, ((0, 0), (0, n_pad - N)))

    grid = (n_pad // tn, k_pad // tk)

    out = pl.pallas_call(
        noisy_linear_kernel,
        out_shape=jax.ShapeDtypeStruct((b_pad, n_pad), jnp.float32),
        grid_spec=pltpu.PrefetchScalarGridSpec(
            num_scalar_prefetch=0,
            grid=grid,
            in_specs=[
                pl.BlockSpec((b_pad, tk), lambda n, k: (0, k)),   # x (bf16)
                pl.BlockSpec((tk, tn), lambda n, k: (k, n)),      # W^T (bf16)
                pl.BlockSpec((tk, tn), lambda n, k: (k, n)),      # noisy_W^T (bf16)
                pl.BlockSpec((1, tk), lambda n, k: (0, k)),       # in_noise row
                pl.BlockSpec((1, tn), lambda n, k: (0, n)),       # out_noise row
                pl.BlockSpec((1, tn), lambda n, k: (0, n)),       # combined bias
            ],
            out_specs=pl.BlockSpec((b_pad, tn), lambda n, k: (0, n)),
            scratch_shapes=[pltpu.VMEM((b_pad, tn), jnp.float32)],
        ),
        compiler_params=pltpu.CompilerParams(
            dimension_semantics=("parallel", "arbitrary"),
            vmem_limit_bytes=48 * 1024 * 1024,
        ),
    )(x_p, wt, nwt, in_row, out_row, bias_p)

    return out[:B, :N]


def reference_forward(x, weight, bias, noisy_weight, noisy_bias,
                      in_noise, out_noise):
    """Pure-JAX f32 reference matching the PyTorch forward (training mode)."""
    normal_y = x @ weight.T + bias
    noise = jnp.outer(out_noise, in_noise)
    noisy_w = noisy_weight * noise
    noisy_b = noisy_bias * out_noise
    noisy_y = x @ noisy_w.T + noisy_b
    return noisy_y + normal_y


def _make_case(key, in_features, out_features, batch, sigma0=0.5):
    noise_std = sigma0 / math.sqrt(in_features)
    stdv = 1.0 / math.sqrt(in_features)
    kx, kw, kb, knw, knb, kin, kout = jax.random.split(key, 7)

    weight = jax.random.uniform(kw, (out_features, in_features),
                                minval=-stdv, maxval=stdv, dtype=jnp.float32)
    bias = jax.random.uniform(kb, (out_features,),
                              minval=-stdv, maxval=stdv, dtype=jnp.float32)
    noisy_weight = jax.random.uniform(knw, (out_features, in_features),
                                      minval=-stdv, maxval=stdv, dtype=jnp.float32)
    noisy_bias = jax.random.uniform(knb, (out_features,),
                                    minval=-stdv, maxval=stdv, dtype=jnp.float32)
    # sample_noise(): in_noise, out_noise ~ N(0, noise_std) (deterministic here).
    in_noise = noise_std * jax.random.normal(kin, (in_features,), dtype=jnp.float32)
    out_noise = noise_std * jax.random.normal(kout, (out_features,), dtype=jnp.float32)
    x = jax.random.normal(kx, (batch, in_features), dtype=jnp.float32)
    return x, weight, bias, noisy_weight, noisy_bias, in_noise, out_noise


def _run_case(key, in_features, out_features, batch, *, tn, tk, atol, rtol):
    x, w, b, nw, nb, in_n, out_n = _make_case(key, in_features, out_features, batch)
    params = prepare_noisy_linear_params(w, nw, tn=tn, tk=tk)  # one-time prep
    y = noisy_linear_forward(x, params, b, nb, in_n, out_n)
    y = jax.block_until_ready(y)
    y_ref = reference_forward(x, w, b, nw, nb, in_n, out_n)
    assert y.shape == (batch, out_features)
    assert jnp.allclose(y, y_ref, atol=atol, rtol=rtol), (
        f"mismatch vs reference: max abs err = {jnp.max(jnp.abs(y - y_ref))}")


if __name__ == "__main__":
    key = jax.random.PRNGKey(0)
    k1, k2 = jax.random.split(key, 2)

    # Case 1: small module-consistent shapes (single grid cell).
    _run_case(k1, in_features=32, out_features=64, batch=8,
              tn=512, tk=2048, atol=2e-2, rtol=2e-2)

    # Case 2: forces the multi-tile K-reduction + multi-N path (grid 3x3) and
    # batch padding, with deliberately small tiles.
    _run_case(k2, in_features=384, out_features=320, batch=5,
              tn=128, tk=128, atol=2e-2, rtol=2e-2)

    print("KERNEL_OK")
</pallas_src>

<mosaic_0001>
module attributes {stable_mosaic.version = 11 : i64} {
  func.func @noisy_linear_kernel(%arg0: i32, %arg1: i32, %arg2: memref<8x128xbf16, #tpu.memory_space<vmem>>, %arg3: memref<128x128xbf16, #tpu.memory_space<vmem>>, %arg4: memref<128x128xbf16, #tpu.memory_space<vmem>>, %arg5: memref<1x128xf32, #tpu.memory_space<vmem>>, %arg6: memref<1x128xf32, #tpu.memory_space<vmem>>, %arg7: memref<1x128xf32, #tpu.memory_space<vmem>>, %arg8: memref<8x128xf32, #tpu.memory_space<vmem>>, %arg9: memref<8x128xf32, #tpu.memory_space<vmem>>) attributes {dimension_semantics = [#tpu.dimension_semantics<parallel>, #tpu.dimension_semantics<arbitrary>], iteration_bounds = array<i64: 1, 1>, scalar_prefetch = 0 : i64, scratch_operands = 1 : i64, tpu.core_type = #tpu.core_type<tc>, window_params = [{transform_indices = @transform_0, window_bounds = array<i64: 8, 128>}, {transform_indices = @transform_1, window_bounds = array<i64: 128, 128>}, {transform_indices = @transform_2, window_bounds = array<i64: 128, 128>}, {transform_indices = @transform_3, window_bounds = array<i64: 1, 128>}, {transform_indices = @transform_4, window_bounds = array<i64: 1, 128>}, {transform_indices = @transform_5, window_bounds = array<i64: 1, 128>}, {transform_indices = @transform_6, window_bounds = array<i64: 8, 128>}]} {
    %c0_i32 = arith.constant 0 : i32
    %0 = arith.cmpi eq, %arg1, %c0_i32 : i32
    %1 = arith.extui %0 : i1 to i32
    %c0_i32_0 = arith.constant 0 : i32
    %2 = arith.cmpi ne, %1, %c0_i32_0 : i32
    scf.if %2 {
      %cst_19 = arith.constant 0.000000e+00 : f32
      %22 = vector.broadcast %cst_19 : f32 to vector<8x128xf32>
      %c0_20 = arith.constant 0 : index
      %c0_21 = arith.constant 0 : index
      %23 = vector.load %arg8[%c0_20, %c0_21] : memref<8x128xf32, #tpu.memory_space<vmem>>, vector<8x128xf32>
      tpu.vector_store %arg8[%c0_20, %c0_21], %22 {strides = array<i32>} : memref<8x128xf32, #tpu.memory_space<vmem>>, vector<8x128xf32>,
      %cst_22 = arith.constant 0.000000e+00 : f32
      %24 = vector.broadcast %cst_22 : f32 to vector<8x128xf32>
      %c0_23 = arith.constant 0 : index
      %c0_24 = arith.constant 0 : index
      %25 = vector.load %arg9[%c0_23, %c0_24] : memref<8x128xf32, #tpu.memory_space<vmem>>, vector<8x128xf32>
      tpu.vector_store %arg9[%c0_23, %c0_24], %24 {strides = array<i32>} : memref<8x128xf32, #tpu.memory_space<vmem>>, vector<8x128xf32>,
    } else {
    }
    %c0 = arith.constant 0 : index
    %c0_1 = arith.constant 0 : index
    %3 = vector.load %arg2[%c0, %c0_1] : memref<8x128xbf16, #tpu.memory_space<vmem>>, vector<8x128xbf16>
    %c0_2 = arith.constant 0 : index
    %c0_3 = arith.constant 0 : index
    %4 = vector.load %arg8[%c0_2, %c0_3] : memref<8x128xf32, #tpu.memory_space<vmem>>, vector<8x128xf32>
    %c0_4 = arith.constant 0 : index
    %c0_5 = arith.constant 0 : index
    %5 = vector.load %arg3[%c0_4, %c0_5] : memref<128x128xbf16, #tpu.memory_space<vmem>>, vector<128x128xbf16>
    %cst = arith.constant dense<0.000000e+00> : vector<8x128xf32>
    %6 = tpu.matmul %3, %5, %cst {dimension_numbers = #tpu.dot_dimension_numbers<[1], [0], [0], [1], [0, 0, 1, 1], [], []>} : vector<8x128xbf16>, vector<128x128xbf16>, vector<8x128xf32> -> vector<8x128xf32>
    %7 = arith.addf %4, %6 : vector<8x128xf32>
    %c0_6 = arith.constant 0 : index
    %c0_7 = arith.constant 0 : index
    %8 = vector.load %arg8[%c0_6, %c0_7] : memref<8x128xf32, #tpu.memory_space<vmem>>, vector<8x128xf32>
    tpu.vector_store %arg8[%c0_6, %c0_7], %7 {strides = array<i32>} : memref<8x128xf32, #tpu.memory_space<vmem>>, vector<8x128xf32>,
    %9 = arith.extf %3 : vector<8x128xbf16> to vector<8x128xf32>
    %c0_8 = arith.constant 0 : index
    %c0_9 = arith.constant 0 : index
    %10 = vector.load %arg5[%c0_8, %c0_9] : memref<1x128xf32, #tpu.memory_space<vmem>>, vector<1x128xf32>
    %11 = vector.broadcast %10 : vector<1x128xf32> to vector<8x128xf32>
    %12 = arith.mulf %9, %11 : vector<8x128xf32>
    %13 = arith.truncf %12 : vector<8x128xf32> to vector<8x128xbf16>
    %c0_10 = arith.constant 0 : index
    %c0_11 = arith.constant 0 : index
    %14 = vector.load %arg9[%c0_10, %c0_11] : memref<8x128xf32, #tpu.memory_space<vmem>>, vector<8x128xf32>
    %c0_12 = arith.constant 0 : index
    %c0_13 = arith.constant 0 : index
    %15 = vector.load %arg4[%c0_12, %c0_13] : memref<128x128xbf16, #tpu.memory_space<vmem>>, vector<128x128xbf16>
    %cst_14 = arith.constant dense<0.000000e+00> : vector<8x128xf32>
    %16 = tpu.matmul %13, %15, %cst_14 {dimension_numbers = #tpu.dot_dimension_numbers<[1], [0], [0], [1], [0, 0, 1, 1], [], []>} : vector<8x128xbf16>, vector<128x128xbf16>, vector<8x128xf32> -> vector<8x128xf32>
    %17 = arith.addf %14, %16 : vector<8x128xf32>
    %c0_15 = arith.constant 0 : index
    %c0_16 = arith.constant 0 : index
    %18 = vector.load %arg9[%c0_15, %c0_16] : memref<8x128xf32, #tpu.memory_space<vmem>>, vector<8x128xf32>
    tpu.vector_store %arg9[%c0_15, %c0_16], %17 {strides = array<i32>} : memref<8x128xf32, #tpu.memory_space<vmem>>, vector<8x128xf32>,
    %c0_i32_17 = arith.constant 0 : i32
    %19 = arith.cmpi eq, %arg1, %c0_i32_17 : i32
    %20 = arith.extui %19 : i1 to i32
    %c0_i32_18 = arith.constant 0 : i32
    %21 = arith.cmpi ne, %20, %c0_i32_18 : i32
    scf.if %21 {
      %c0_19 = arith.constant 0 : index
      %c0_20 = arith.constant 0 : index
      %22 = vector.load %arg8[%c0_19, %c0_20] : memref<8x128xf32, #tpu.memory_space<vmem>>, vector<8x128xf32>
      %c0_21 = arith.constant 0 : index
      %c0_22 = arith.constant 0 : index
      %23 = vector.load %arg9[%c0_21, %c0_22] : memref<8x128xf32, #tpu.memory_space<vmem>>, vector<8x128xf32>
      %c0_23 = arith.constant 0 : index
      %c0_24 = arith.constant 0 : index
      %24 = vector.load %arg6[%c0_23, %c0_24] : memref<1x128xf32, #tpu.memory_space<vmem>>, vector<1x128xf32>
      %25 = vector.broadcast %24 : vector<1x128xf32> to vector<8x128xf32>
      %26 = arith.mulf %23, %25 : vector<8x128xf32>
      %27 = arith.addf %22, %26 : vector<8x128xf32>
      %c0_25 = arith.constant 0 : index
      %c0_26 = arith.constant 0 : index
      %28 = vector.load %arg7[%c0_25, %c0_26] : memref<1x128xf32, #tpu.memory_space<vmem>>, vector<1x128xf32>
      %29 = vector.broadcast %28 : vector<1x128xf32> to vector<8x128xf32>
      %30 = arith.addf %27, %29 : vector<8x128xf32>
      %c0_27 = arith.constant 0 : index
      %c0_28 = arith.constant 0 : index
      %31 = vector.load %arg8[%c0_27, %c0_28] : memref<8x128xf32, #tpu.memory_space<vmem>>, vector<8x128xf32>
      tpu.vector_store %arg8[%c0_27, %c0_28], %30 {strides = array<i32>} : memref<8x128xf32, #tpu.memory_space<vmem>>, vector<8x128xf32>,
    } else {
    }
    return
  }
  func.func @transform_0(%arg0: i32, %arg1: i32) -> (i32, i32) {
    %c0_i32 = arith.constant 0 : i32
    %c0_i32_0 = arith.constant 0 : i32
    return %c0_i32, %arg1 : i32, i32
  }
  func.func @transform_1(%arg0: i32, %arg1: i32) -> (i32, i32) {
    %c0_i32 = arith.constant 0 : i32
    return %arg1, %arg0 : i32, i32
  }
  func.func @transform_2(%arg0: i32, %arg1: i32) -> (i32, i32) {
    %c0_i32 = arith.constant 0 : i32
    return %arg1, %arg0 : i32, i32
  }
  func.func @transform_3(%arg0: i32, %arg1: i32) -> (i32, i32) {
    %c0_i32 = arith.constant 0 : i32
    %c0_i32_0 = arith.constant 0 : i32
    return %c0_i32, %arg1 : i32, i32
  }
  func.func @transform_4(%arg0: i32, %arg1: i32) -> (i32, i32) {
    %c0_i32 = arith.constant 0 : i32
    %c0_i32_0 = arith.constant 0 : i32
    return %c0_i32, %arg0 : i32, i32
  }
  func.func @transform_5(%arg0: i32, %arg1: i32) -> (i32, i32) {
    %c0_i32 = arith.constant 0 : i32
    %c0_i32_0 = arith.constant 0 : i32
    return %c0_i32, %arg0 : i32, i32
  }
  func.func @transform_6(%arg0: i32, %arg1: i32) -> (i32, i32) {
    %c0_i32 = arith.constant 0 : i32
    %c0_i32_0 = arith.constant 0 : i32
    return %c0_i32, %arg0 : i32, i32
  }
}

</mosaic_0001>

<bundles_post_ra>
// kernel: tpu_custom_call.1
= control target key start
LH: loop header
LB: loop body
LE: loop exit
PB: predicated region body
PF: predicated region fallthrough
CT: control target
= control target key end

     0   :  { %11 = vsyncpa [#allocation4], 0  ;;  %s585_s0 = inlined_call_operand.hbm [shape: bf16[8,128], index: 0, kind: input, shape index: {}]   ;;  %s586_s1 = inlined_call_operand.hbm [shape: bf16[128,128], index: 1, kind: input, shape index: {}]   ;;  %s587_s2 = inlined_call_operand.hbm [shape: bf16[128,128], index: 2, kind: input, shape index: {}]   ;;  %s588_s3 = inlined_call_operand.vmem [shape: f32[1,128], index: 3, kind: input, shape index: {}]   ;;  %s589_s4 = inlined_call_operand.vmem [shape: f32[1,128], index: 4, kind: input, shape index: {}]   ;;  %s590_s5 = inlined_call_operand.vmem [shape: f32[1,128], index: 5, kind: input, shape index: {}]   ;;  %s591_s6 = inlined_call_operand.hbm [shape: f32[8,128], index: 6, kind: output, shape index: {}]  }
   0x1   :  { %12 = vsyncpa [#allocation7], 0 }
   0x2   :  { %13 = vsyncpa [#allocation5], 0  ;;  %s521_s21 = smov [#allocation6]  }
   0x3   :  { %s29_s22 = sshll.u32 %s521_s21, 4  ;;  %s30_s22 = int_to_ptr.vmem [resolvable:$true] %s29_s22 }
   0x4   :  { %s443_s23 = scalar_lea.vmem %s30_s22, 1024  ;;  %p448_p1 = scmp.lt.s32.totalorder %s30_s22, %s30_s22 }
   0x5   :  { %p444_p0 = scmp.ne.s32.totalorder %s30_s22, %s443_s23  ;;  %p449_p2 = scmp.lt.s32.totalorder %s443_s23, %s443_s23 }
   0x7   :  { %p450_p3 = por %p449_p2, %p448_p1 }
   0x9   :  { %p451_p4 = pnand %p450_p3, %p444_p0 }
   0xb   :  { %454 = shalt.err (!%p451_p4)
}
   0xc   :  { %s522_s24 = smov 64   ;;  %s523_s25 = smov 4  }
   0xd   :  { %35 = dma.hbm_to_vmem [thread:$0]  %s586_s1, 1024, %s30_s22, [#allocation7], %s522_s24, %s522_s24, %s523_s25  }
   0xe   :  { %s524_s28 = smov [#allocation3]   ;;  %s525_s30 = smov [#allocation8]  }
   0xf   :  { %s20_s29 = sshll.u32 %s524_s28, 4  ;;  %s41_s7 = sshll.u32 %s525_s30, 4  ;;  %s21_s29 = int_to_ptr.vmem [resolvable:$true] %s20_s29  ;;  %s42_s7 = int_to_ptr.vmem [resolvable:$true] %s41_s7 }
  0x10   :  { %s463_s8 = scalar_lea.vmem %s21_s29, 64  ;;  %p468_p6 = scmp.lt.s32.totalorder %s21_s29, %s21_s29 }
  0x11   :  { %p464_p5 = scmp.ne.s32.totalorder %s21_s29, %s463_s8  ;;  %p469_p7 = scmp.lt.s32.totalorder %s463_s8, %s463_s8 }
  0x13   :  { %p470_p8 = por %p469_p7, %p468_p6 }
  0x15   :  { %p471_p9 = pnand %p470_p8, %p464_p5 }
  0x17   :  { %474 = shalt.err (!%p471_p9)
}
  0x18   :  { %23 = dma.hbm_to_vmem [thread:$0]  %s585_s0, 64, %s21_s29, [#allocation4]  }
  0x19   :  { %s483_s11 = scalar_lea.vmem %s42_s7, 1024  ;;  %p488_p11 = scmp.lt.s32.totalorder %s42_s7, %s42_s7 }
  0x1a   :  { %p484_p10 = scmp.ne.s32.totalorder %s42_s7, %s483_s11  ;;  %p489_p12 = scmp.lt.s32.totalorder %s483_s11, %s483_s11 }
  0x1c   :  { %p490_p13 = por %p489_p12, %p488_p11 }
  0x1e   :  { %p491_p0 = pnand %p490_p13, %p484_p10 }
  0x20   :  { %494 = shalt.err (!%p491_p0)
}
  0x21   :  { %47 = dma.hbm_to_vmem [thread:$0]  %s587_s2, 1024, %s42_s7, [#allocation7], %s522_s24, %s522_s24, %s523_s25  }
  0x22   :  { %515 = dma.done.wait [#allocation4], 64  }
  0x23   :  { %516 = vsyncadd [#allocation4], 4294967232 }
  0x24   :  { %517 = dma.done.wait [#allocation7], 2048  }
  0x25   :  { %518 = vsyncadd [#allocation7], 4294965248  ;;  %v526_v0 = vmov 0.0   ;;  %vm527_vm0 = vmmov 0   ;;  %v419_v1 = vld [vmem:[#allocation6 + $0x38] sm:$0xff]   ;;  %v421_v3 = vld [vmem:[#allocation6 + $0x30] sm:$0xff]  }
  0x26   :  { %371 = vmatprep.subr.bf16.mxu0 %v526_v0  ;;  %391 = vmatprep.subr.bf16.mxu1 %v526_v0  ;;  %v420_v2 = vld [vmem:[#allocation8 + $0x38] sm:$0xff]   ;;  %v422_v4 = vld [vmem:[#allocation8 + $0x30] sm:$0xff]   ;;  %v423_v5 = vld [vmem:[#allocation6 + $0x28] sm:$0xff]   ;;  %s528_s16 = smov [#allocation9]  }
  0x27   :  { %387 = vmatprep.mubr.msk.bf16.mxu0 %vm527_vm0, %v526_v0  ;;  %407 = vmatprep.mubr.msk.bf16.mxu1 %vm527_vm0, %v526_v0  ;;  %v424_v6 = vld [vmem:[#allocation8 + $0x28] sm:$0xff]   ;;  %v425_v7 = vld [vmem:[#allocation6 + $0x20] sm:$0xff]   ;;  %v427_v9 = vld [vmem:[#allocation6 + $0x18] sm:$0xff]   ;;  %s324_s17 = sshll.u32 %s528_s16, 4  ;;  %s325_s17 = int_to_ptr.vmem [resolvable:$true] %s324_s17 }
  0x28   :  { %372 = vmatpush3.bf16.msra.mxu0 %v419_v1  ;;  %392 = vmatpush3.bf16.msra.mxu1 %v420_v2  ;;  %v426_v8 = vld [vmem:[#allocation8 + $0x20] sm:$0xff]   ;;  %v428_v10 = vld [vmem:[#allocation8 + $0x18] sm:$0xff]   ;;  %v429_v11 = vld [vmem:[#allocation6 + $0x10] sm:$0xff]   ;;  %p500_p2 = scmp.lt.s32.totalorder %s325_s17, %s325_s17 }
  0x29   :  { %373 = vmatprep.subr.bf16.mxu0 %v526_v0  ;;  %393 = vmatprep.subr.bf16.mxu1 %v526_v0  ;;  %v430_v12 = vld [vmem:[#allocation8 + $0x10] sm:$0xff]   ;;  %v70_v13 = vld [vmem:[#allocation3] sm:$0xf]  ;;  %v431_v14 = vld [vmem:[#allocation6 + $0x8] sm:$0xff]  }
  0x2a   :  { %v178_v15 = vunpack.c.l.bf16 %v70_v13  ;;  %v432_v16 = vld [vmem:[#allocation8 + $0x8] sm:$0xff]   ;;  %v342_v17 = vld [vmem:[%s588_s3] ss:$0 sm:$0xff]  ;;  %v433_v18 = vld [vmem:[#allocation6] sm:$0xff]  }
  0x2b   :  { %v434_v20 = vld [vmem:[#allocation8] sm:$0xff]   ;;  %v351_v22 = vld [vmem:[%s589_s4] ss:$0 sm:$0xff]  ;;  %s495_s4 = scalar_lea.vmem %s325_s17, 128 }
  0x2c   :  { %374 = vmatpush3.bf16.msra.mxu0 %v421_v3  ;;  %394 = vmatpush3.bf16.msra.mxu1 %v422_v4  ;;  %v186_v19 = vmul.f32 %v342_v17, %v178_v15  ;;  %v352_v27 = vld [vmem:[%s590_s5] ss:$0 sm:$0xff]  ;;  %p496_p1 = scmp.ne.s32.totalorder %s325_s17, %s495_s4  ;;  %p501_p3 = scmp.lt.s32.totalorder %s495_s4, %s495_s4 }
  0x2d   :  { %375 = vmatprep.subr.bf16.mxu0 %v526_v0  ;;  %395 = vmatprep.subr.bf16.mxu1 %v526_v0 }
  0x2e   :  { %v187_v21 = vpack.c.bf16 %v186_v19, %v186_v19  ;;  %p502_p4 = por %p501_p3, %p500_p2 }
  0x30   :  { %376 = vmatpush3.bf16.msra.mxu0 %v423_v5  ;;  %396 = vmatpush3.bf16.msra.mxu1 %v424_v6  ;;  %p503_p5 = pnand %p502_p4, %p496_p1 }
  0x31   :  { %377 = vmatprep.subr.bf16.mxu0 %v526_v0  ;;  %397 = vmatprep.subr.bf16.mxu1 %v526_v0 }
  0x34   :  { %378 = vmatpush3.bf16.msra.mxu0 %v425_v7  ;;  %398 = vmatpush3.bf16.msra.mxu1 %v426_v8 }
  0x35   :  { %379 = vmatprep.subr.bf16.mxu0 %v526_v0  ;;  %399 = vmatprep.subr.bf16.mxu1 %v526_v0 }
  0x38   :  { %380 = vmatpush3.bf16.msra.mxu0 %v427_v9  ;;  %400 = vmatpush3.bf16.msra.mxu1 %v428_v10 }
  0x39   :  { %381 = vmatprep.subr.bf16.mxu0 %v526_v0  ;;  %401 = vmatprep.subr.bf16.mxu1 %v526_v0 }
  0x3c   :  { %382 = vmatpush3.bf16.msra.mxu0 %v429_v11  ;;  %402 = vmatpush3.bf16.msra.mxu1 %v430_v12 }
  0x3d   :  { %383 = vmatprep.subr.bf16.mxu0 %v526_v0  ;;  %403 = vmatprep.subr.bf16.mxu1 %v526_v0 }
  0x40   :  { %384 = vmatpush3.bf16.msra.mxu0 %v431_v14  ;;  %404 = vmatpush3.bf16.msra.mxu1 %v432_v16 }
  0x41   :  { %385 = vmatprep.subr.bf16.mxu0 %v526_v0  ;;  %405 = vmatprep.subr.bf16.mxu1 %v526_v0 }
  0x44   :  { %386 = vmatpush3.bf16.msra.mxu0 %v433_v18  ;;  %406 = vmatpush3.bf16.msra.mxu1 %v434_v20 }
  0x47   :  { %388 = vmatmul.mubr.bf16.vlgmr.msra.gmra.mxu0 %v70_v13  ;;  %408 = vmatmul.mubr.bf16.vlgmr.msra.gmra.mxu1 %v187_v21 }
 0x107   :  { %v170_v23 = vpop.f32.mrf.mxu0  ;;  %v287_v24 = vpop.f32.mrf.mxu1 }
 0x108   :  { %v307_v26 = vmul.f32 %v351_v22, %v287_v24 }
 0x109   :  { %v389_v25 = vpop.f32.mrf.mxu0  ;;  %v409_v28 = vpop.f32.mrf.mxu1 }
 0x10a   :  { %v308_v29 = vadd.f32 %v307_v26, %v170_v23 }
 0x10b   :  { %v173_v30 = vpop.f32.mrf.mxu0  ;;  %v290_v31 = vpop.f32.mrf.mxu1 }
 0x10c   :  { %v316_v32 = vadd.f32 %v352_v27, %v308_v29 }
 0x10d   :  { %v390_v33 = vpop.f32.mrf.mxu0  ;;  %v410_v34 = vpop.f32.mrf.mxu1 }
 0x10e   :  { %317 = vst [vmem:[#allocation9] sm:$0xff] %v316_v32 }
 0x10f   :  { %506 = shalt.err (!%p503_p5)
}
 0x110   :  { %327 = dma.vmem_to_hbm [thread:$0]  %s325_s17, 128, %s591_s6, [#allocation5]  }
 0x111   :  { %519 = dma.done.wait [#allocation5], 128  }
 0x112   :  { %520 = vsyncadd [#allocation5], 4294967168 }
 0x113   :  { %331 = vsyncpa [#allocation4], 1 }
 0x114   :  { %332 = vsyncpa [#allocation7], 1 }
 0x115   :  { %333 = vsyncpa [#allocation5], 1 }

</bundles_post_ra>
